<compile_context>
chip_gen: v5e
topology: v5e:2x2
jax: 0.10.0
libtpu: 0.0.40
codegen_flags: <defaults>
</compile_context>

<pallas_src>
import jax
import jax.numpy as jnp
from jax.experimental import pallas as pl
from jax.experimental.pallas import tpu as pltpu


def _round_up(x, m):
    return ((x + m - 1) // m) * m


def _choose_tb(B, block_b, *, min_steps=4):
    """Batch tile: multiple of 8, <= block_b, >= min_steps grid steps when B is
    large enough (v7x: 2 TCs x double-buffering), with bounded padding waste."""
    tb = max(8, (min(block_b, _round_up(B, 8)) // 8) * 8)

    def halve(t):
        return max(8, ((t // 2 + 7) // 8) * 8)

    # Keep the 1-D "parallel" grid long enough to feed both v7x TensorCores and
    # keep the activation DMA double-buffer busy (>=2 steps/core).
    while tb > 8 and B > min_steps * 8 and pl.cdiv(B, tb) < min_steps:
        tb = halve(tb)
    # Bound pure-waste padded rows (they cost HBM reads, compute and writeback).
    while tb > 8 and (_round_up(B, tb) - B) > max(B // 8, 64):
        tb = halve(tb)
    return tb


def similarity_kernel(lvec_ref, rvec_ref, whm_ref, wha_ref, whb_ref,
                      wpw_ref, wpb_ref, out_ref):
    # Activations stream in bf16; widen to f32 before the VPU mult/abs so the
    # kernel is also correct on v5e (no bf16 VPU).  Accumulation is f32.
    l = lvec_ref[...].astype(jnp.float32)
    r = rvec_ref[...].astype(jnp.float32)

    # Element-wise distance features (VPU).
    mult_dist = l * r
    abs_dist = jnp.abs(l - r)

    # Hidden layer: sigmoid(mult @ Wh_mult + abs @ Wh_abs + bh).
    # Two MXU dots accumulate into the same f32 result; no lane concat needed.
    h = jnp.dot(mult_dist, whm_ref[...], preferred_element_type=jnp.float32)
    h = h + jnp.dot(abs_dist, wha_ref[...], preferred_element_type=jnp.float32)
    h = jax.nn.sigmoid(h + whb_ref[...])

    # Output layer on the lane-dense padded class axis (compute only).  Padded
    # columns carry zero weight and a -1e30 bias -> exp() underflows to 0, so
    # they contribute nothing to the softmax denominator.
    logits = jnp.dot(h, wpw_ref[...], preferred_element_type=jnp.float32)
    logits = logits + wpb_ref[...]

    # log_softmax over the class axis.
    m = jnp.max(logits, axis=-1, keepdims=True)
    shifted = logits - m
    lse = jnp.log(jnp.sum(jnp.exp(shifted), axis=-1, keepdims=True))
    logp = shifted - lse

    # Store only the real class columns (narrow masked store): padded columns
    # never touch HBM and no post-kernel column slice is needed.
    nc = out_ref.shape[-1]
    out_ref[...] = logp[:, :nc].astype(out_ref.dtype)


def similarity_forward(lvec, rvec, wh_w, wh_b, wp_w, wp_b, *,
                       block_b=1024, activation_dtype=jnp.bfloat16):
    """lvec, rvec: (B, 2*mem_dim) float32.
    wh_w: (4*mem_dim, hidden), wh_b: (1, hidden),
    wp_w: (hidden, num_classes), wp_b: (1, num_classes).
    Weights are stored as (in, out), i.e. the transpose of nn.Linear.weight."""
    B, feat = lvec.shape                     # feat = 2 * mem_dim
    hidden = wh_w.shape[1]
    num_classes = wp_w.shape[1]

    # --- wrapper-side weight prep (one-time, zero cost inside the kernel) ---
    # Split the hidden weight so the kernel never concatenates along lanes.
    wh_mult = wh_w[:feat, :]                 # multiplies mult_dist
    wh_abs = wh_w[feat:, :]                  # multiplies abs_dist

    # Lane-dense class axis for COMPUTE only (output stays narrow).
    c_pad = _round_up(max(num_classes, 1), 128)
    wp_w_p = jnp.zeros((hidden, c_pad), wp_w.dtype).at[:, :num_classes].set(wp_w)
    wp_b_p = jnp.full((1, c_pad), -1e30, wp_b.dtype).at[:, :num_classes].set(wp_b)

    # bf16 activation stream: halves the dominant HBM read.
    lvec = lvec.astype(activation_dtype)
    rvec = rvec.astype(activation_dtype)

    # --- batch tiling ---
    tb = _choose_tb(B, block_b)
    b_pad = _round_up(B, tb)
    if b_pad != B:
        pad = b_pad - B
        lvec = jnp.pad(lvec, ((0, pad), (0, 0)))
        rvec = jnp.pad(rvec, ((0, pad), (0, 0)))

    grid = (b_pad // tb,)

    act_spec = pl.BlockSpec((tb, feat), lambda i: (i, 0))
    resident = lambda shape: pl.BlockSpec(shape, lambda i: (0, 0))

    act_bytes = jnp.dtype(activation_dtype).itemsize
    flops = 2 * b_pad * (2 * feat * hidden + hidden * c_pad)
    transcendentals = b_pad * (hidden + c_pad + 1)       # sigmoid + exp + log
    bytes_accessed = (2 * b_pad * feat * act_bytes               # activations
                      + b_pad * num_classes * 4                  # narrow output
                      + 4 * (2 * feat * hidden + hidden          # resident
                             + hidden * c_pad + c_pad))          # weights/biases

    # VMEM use (double-buffered acts + narrow output + resident weights) is a
    # few hundred KiB even at tb=2048 — far below the scoped default on every
    # generation, so no vmem_limit_bytes override is needed.
    out = pl.pallas_call(
        similarity_kernel,
        out_shape=jax.ShapeDtypeStruct((b_pad, num_classes), jnp.float32),
        grid=grid,
        in_specs=[
            act_spec,                      # lvec tile (streamed, bf16)
            act_spec,                      # rvec tile (streamed, bf16)
            resident(wh_mult.shape),       # weights stay VMEM-resident
            resident(wh_abs.shape),
            resident(wh_b.shape),
            resident(wp_w_p.shape),
            resident(wp_b_p.shape),
        ],
        out_specs=pl.BlockSpec((tb, num_classes), lambda i: (i, 0)),
        compiler_params=pltpu.CompilerParams(
            dimension_semantics=("parallel",)),
        cost_estimate=pl.CostEstimate(
            flops=flops,
            transcendentals=transcendentals,
            bytes_accessed=bytes_accessed),
    )(lvec, rvec, wh_mult, wh_abs, wh_b, wp_w_p, wp_b_p)

    # Only padded batch rows (if any) need trimming; class axis is already exact.
    return out if b_pad == B else out[:B]


if __name__ == "__main__":
    # Small shapes consistent with the module:
    #   lvec/rvec have 2*mem_dim features each -> split weight halves see 2*mem_dim.
    B = 16
    mem_dim = 32
    hidden_dim = 32
    num_classes = 8

    key = jax.random.PRNGKey(0)
    k1, k2, k3, k4, k5, k6 = jax.random.split(key, 6)

    lvec = jax.random.normal(k1, (B, 2 * mem_dim), dtype=jnp.float32)
    rvec = jax.random.normal(k2, (B, 2 * mem_dim), dtype=jnp.float32)

    # Deterministic parameter init. Stored as (in, out) — i.e. W.T of nn.Linear.
    wh_w = jax.random.normal(k3, (4 * mem_dim, hidden_dim), dtype=jnp.float32) * 0.1
    wh_b = jax.random.normal(k4, (1, hidden_dim), dtype=jnp.float32) * 0.1
    wp_w = jax.random.normal(k5, (hidden_dim, num_classes), dtype=jnp.float32) * 0.1
    wp_b = jax.random.normal(k6, (1, num_classes), dtype=jnp.float32) * 0.1

    # Small block_b so the tiny example still exercises a multi-step grid.
    out = similarity_forward(lvec, rvec, wh_w, wh_b, wp_w, wp_b, block_b=8)
    jax.block_until_ready(out)

    # Reference check in plain JAX (mirrors the PyTorch forward exactly), on the
    # same bf16-quantized activations the kernel streams.
    lq = lvec.astype(jnp.bfloat16).astype(jnp.float32)
    rq = rvec.astype(jnp.bfloat16).astype(jnp.float32)
    vec = jnp.concatenate([lq * rq, jnp.abs(lq - rq)], axis=1)
    h = jax.nn.sigmoid(vec @ wh_w + wh_b)
    logits = h @ wp_w + wp_b
    ref = jax.nn.log_softmax(logits, axis=-1)

    assert out.shape == (B, num_classes)
    assert jnp.allclose(out, ref, atol=1e-4, rtol=1e-4), "mismatch vs reference"

    print("KERNEL_OK")
</pallas_src>

<mosaic_0001>
module attributes {stable_mosaic.version = 11 : i64} {
  func.func @similarity_kernel(%arg0: i32, %arg1: memref<8x64xbf16, #tpu.memory_space<vmem>>, %arg2: memref<8x64xbf16, #tpu.memory_space<vmem>>, %arg3: memref<64x32xf32, #tpu.memory_space<vmem>>, %arg4: memref<64x32xf32, #tpu.memory_space<vmem>>, %arg5: memref<1x32xf32, #tpu.memory_space<vmem>>, %arg6: memref<32x128xf32, #tpu.memory_space<vmem>>, %arg7: memref<1x128xf32, #tpu.memory_space<vmem>>, %arg8: memref<8x8xf32, #tpu.memory_space<vmem>>) attributes {dimension_semantics = [#tpu.dimension_semantics<parallel>], iteration_bounds = array<i64: 2>, scalar_prefetch = 0 : i64, scratch_operands = 0 : i64, tpu.core_type = #tpu.core_type<tc>, window_params = [{transform_indices = @transform_0, window_bounds = array<i64: 8, 64>}, {transform_indices = @transform_1, window_bounds = array<i64: 8, 64>}, {pipeline_mode = #tpu.pipeline_mode<synchronous>, transform_indices = @transform_2, window_bounds = array<i64: 64, 32>}, {pipeline_mode = #tpu.pipeline_mode<synchronous>, transform_indices = @transform_3, window_bounds = array<i64: 64, 32>}, {pipeline_mode = #tpu.pipeline_mode<synchronous>, transform_indices = @transform_4, window_bounds = array<i64: 1, 32>}, {pipeline_mode = #tpu.pipeline_mode<synchronous>, transform_indices = @transform_5, window_bounds = array<i64: 32, 128>}, {pipeline_mode = #tpu.pipeline_mode<synchronous>, transform_indices = @transform_6, window_bounds = array<i64: 1, 128>}, {transform_indices = @transform_7, window_bounds = array<i64: 8, 8>}]} {
    %c0 = arith.constant 0 : index
    %c0_0 = arith.constant 0 : index
    %0 = vector.load %arg1[%c0, %c0_0] : memref<8x64xbf16, #tpu.memory_space<vmem>>, vector<8x64xbf16>
    %1 = arith.extf %0 : vector<8x64xbf16> to vector<8x64xf32>
    %c0_1 = arith.constant 0 : index
    %c0_2 = arith.constant 0 : index
    %2 = vector.load %arg2[%c0_1, %c0_2] : memref<8x64xbf16, #tpu.memory_space<vmem>>, vector<8x64xbf16>
    %3 = arith.extf %2 : vector<8x64xbf16> to vector<8x64xf32>
    %4 = arith.mulf %1, %3 : vector<8x64xf32>
    %5 = arith.subf %1, %3 : vector<8x64xf32>
    %6 = math.absf %5 : vector<8x64xf32>
    %c0_3 = arith.constant 0 : index
    %c0_4 = arith.constant 0 : index
    %7 = vector.load %arg3[%c0_3, %c0_4] : memref<64x32xf32, #tpu.memory_space<vmem>>, vector<64x32xf32>
    %cst = arith.constant dense<0.000000e+00> : vector<8x32xf32>
    %8 = tpu.matmul %4, %7, %cst {dimension_numbers = #tpu.dot_dimension_numbers<[1], [0], [0], [1], [0, 0, 1, 1], [], []>} : vector<8x64xf32>, vector<64x32xf32>, vector<8x32xf32> -> vector<8x32xf32>
    %c0_5 = arith.constant 0 : index
    %c0_6 = arith.constant 0 : index
    %9 = vector.load %arg4[%c0_5, %c0_6] : memref<64x32xf32, #tpu.memory_space<vmem>>, vector<64x32xf32>
    %cst_7 = arith.constant dense<0.000000e+00> : vector<8x32xf32>
    %10 = tpu.matmul %6, %9, %cst_7 {dimension_numbers = #tpu.dot_dimension_numbers<[1], [0], [0], [1], [0, 0, 1, 1], [], []>} : vector<8x64xf32>, vector<64x32xf32>, vector<8x32xf32> -> vector<8x32xf32>
    %11 = arith.addf %8, %10 : vector<8x32xf32>
    %c0_8 = arith.constant 0 : index
    %c0_9 = arith.constant 0 : index
    %12 = vector.load %arg5[%c0_8, %c0_9] : memref<1x32xf32, #tpu.memory_space<vmem>>, vector<1x32xf32>
    %13 = vector.broadcast %12 : vector<1x32xf32> to vector<8x32xf32>
    %14 = arith.addf %11, %13 : vector<8x32xf32>
    %15 = arith.negf %14 : vector<8x32xf32>
    %16 = math.exp %15 : vector<8x32xf32>
    %cst_10 = arith.constant 1.000000e+00 : f32
    %17 = vector.broadcast %cst_10 : f32 to vector<8x32xf32>
    %18 = arith.addf %17, %16 : vector<8x32xf32>
    %19 = arith.divf %17, %18 : vector<8x32xf32>
    %c0_11 = arith.constant 0 : index
    %c0_12 = arith.constant 0 : index
    %20 = vector.load %arg6[%c0_11, %c0_12] : memref<32x128xf32, #tpu.memory_space<vmem>>, vector<32x128xf32>
    %cst_13 = arith.constant dense<0.000000e+00> : vector<8x128xf32>
    %21 = tpu.matmul %19, %20, %cst_13 {dimension_numbers = #tpu.dot_dimension_numbers<[1], [0], [0], [1], [0, 0, 1, 1], [], []>} : vector<8x32xf32>, vector<32x128xf32>, vector<8x128xf32> -> vector<8x128xf32>
    %c0_14 = arith.constant 0 : index
    %c0_15 = arith.constant 0 : index
    %22 = vector.load %arg7[%c0_14, %c0_15] : memref<1x128xf32, #tpu.memory_space<vmem>>, vector<1x128xf32>
    %23 = vector.broadcast %22 : vector<1x128xf32> to vector<8x128xf32>
    %24 = arith.addf %21, %23 : vector<8x128xf32>
    %cst_16 = arith.constant dense<0xFF800000> : vector<8xf32>
    %25 = vector.multi_reduction <maximumf>, %24, %cst_16 [1] : vector<8x128xf32> to vector<8xf32>
    %26 = vector.shape_cast %25 : vector<8xf32> to vector<8x1xf32>
    %27 = vector.broadcast %26 : vector<8x1xf32> to vector<8x128xf32>
    %28 = arith.subf %24, %27 : vector<8x128xf32>
    %29 = math.exp %28 : vector<8x128xf32>
    %cst_17 = arith.constant dense<0.000000e+00> : vector<8xf32>
    %30 = vector.multi_reduction <add>, %29, %cst_17 [1] : vector<8x128xf32> to vector<8xf32>
    %31 = vector.shape_cast %30 : vector<8xf32> to vector<8x1xf32>
    %32 = math.log %31 : vector<8x1xf32>
    %33 = vector.broadcast %32 : vector<8x1xf32> to vector<8x128xf32>
    %34 = arith.subf %28, %33 : vector<8x128xf32>
    %35 = vector.extract_strided_slice %34 {offsets = [0, 0], sizes = [8, 8], strides = [1, 1]} : vector<8x128xf32> to vector<8x8xf32>
    %c0_18 = arith.constant 0 : index
    %c0_19 = arith.constant 0 : index
    %36 = vector.load %arg8[%c0_18, %c0_19] : memref<8x8xf32, #tpu.memory_space<vmem>>, vector<8x8xf32>
    tpu.vector_store %arg8[%c0_18, %c0_19], %35 {strides = array<i32>} : memref<8x8xf32, #tpu.memory_space<vmem>>, vector<8x8xf32>,
    return
  }
  func.func @transform_0(%arg0: i32) -> (i32, i32) {
    %c0_i32 = arith.constant 0 : i32
    %c0_i32_0 = arith.constant 0 : i32
    return %arg0, %c0_i32 : i32, i32
  }
  func.func @transform_1(%arg0: i32) -> (i32, i32) {
    %c0_i32 = arith.constant 0 : i32
    %c0_i32_0 = arith.constant 0 : i32
    return %arg0, %c0_i32 : i32, i32
  }
  func.func @transform_2(%arg0: i32) -> (i32, i32) {
    %c0_i32 = arith.constant 0 : i32
    %c0_i32_0 = arith.constant 0 : i32
    %c0_i32_1 = arith.constant 0 : i32
    return %c0_i32, %c0_i32_0 : i32, i32
  }
  func.func @transform_3(%arg0: i32) -> (i32, i32) {
    %c0_i32 = arith.constant 0 : i32
    %c0_i32_0 = arith.constant 0 : i32
    %c0_i32_1 = arith.constant 0 : i32
    return %c0_i32, %c0_i32_0 : i32, i32
  }
  func.func @transform_4(%arg0: i32) -> (i32, i32) {
    %c0_i32 = arith.constant 0 : i32
    %c0_i32_0 = arith.constant 0 : i32
    %c0_i32_1 = arith.constant 0 : i32
    return %c0_i32, %c0_i32_0 : i32, i32
  }
  func.func @transform_5(%arg0: i32) -> (i32, i32) {
    %c0_i32 = arith.constant 0 : i32
    %c0_i32_0 = arith.constant 0 : i32
    %c0_i32_1 = arith.constant 0 : i32
    return %c0_i32, %c0_i32_0 : i32, i32
  }
  func.func @transform_6(%arg0: i32) -> (i32, i32) {
    %c0_i32 = arith.constant 0 : i32
    %c0_i32_0 = arith.constant 0 : i32
    %c0_i32_1 = arith.constant 0 : i32
    return %c0_i32, %c0_i32_0 : i32, i32
  }
  func.func @transform_7(%arg0: i32) -> (i32, i32) {
    %c0_i32 = arith.constant 0 : i32
    %c0_i32_0 = arith.constant 0 : i32
    return %arg0, %c0_i32 : i32, i32
  }
}

</mosaic_0001>

<bundles_post_ra>
// kernel: tpu_custom_call.1
= control target key start
LH: loop header
LB: loop body
LE: loop exit
PB: predicated region body
PF: predicated region fallthrough
CT: control target
= control target key end

     0   :  { %s574_s24 = smov 0   ;;  %s664_s0 = inlined_call_operand.vmem [shape: bf16[16,64], index: 0, kind: input, shape index: {}]   ;;  %s665_s1 = inlined_call_operand.vmem [shape: bf16[16,64], index: 1, kind: input, shape index: {}]   ;;  %s666_s2 = inlined_call_operand.vmem [shape: f32[64,32], index: 2, kind: input, shape index: {}]   ;;  %s667_s3 = inlined_call_operand.vmem [shape: f32[64,32], index: 3, kind: input, shape index: {}]   ;;  %s668_s4 = inlined_call_operand.vmem [shape: f32[1,32], index: 4, kind: input, shape index: {}]   ;;  %s669_s5 = inlined_call_operand.vmem [shape: f32[32,128], index: 5, kind: input, shape index: {}]   ;;  %s670_s6 = inlined_call_operand.vmem [shape: f32[1,128], index: 6, kind: input, shape index: {}]   ;;  %s671_s7 = inlined_call_operand.vmem [shape: f32[16,8], index: 7, kind: output, shape index: {}]  }
   0x1 LB: > { %s494_s25 = sadd.s32 4294967295, %s532_s24   ;;  %p498_p0 = scmp.ge.s32.totalorder %s532_s24, 1  ;;  %s532_s24 = sphi %s574_s24, %s17_s24  }
   0x2   : > { %p245_p1 = scmp.lt.s32.totalorder %s532_s24, 3 }
   0x4   : > { %p246_p2 = pnand %p498_p0, %p245_p1 }
   0x5   : > { %p279_p3 = scmp.lt.s32.totalorder (!%p246_p2), %s494_s25, 1 }
   0x6   : > { %249 = sbr.rel (%p246_p2) target bundleno = 575 (0x23f), region = 48 }
   0xb   : > { %v313_v0 = vld [vmem:[%s667_s3 + $0x38] sm:$0xff]  ;;  %v312_v2 = vld [vmem:[%s667_s3 + $0x30] sm:$0xff]  ;;  %v311_v4 = vld [vmem:[%s667_s3 + $0x28] sm:$0xff]  ;;  %s673_s25 = smov (!%p279_p3, %s494_s25), 1  ;;  %vm314_vm0 = vcmask 523264   ;;  %vm393_vm4 = vcmask 261120  }
   0xc   : > { %v305_v1 = vld [vmem:[%s666_s2 + $0x38] sm:$0xff]  ;;  %326 = vmatpush.msra.mxu0 %v313_v0  ;;  %v304_v3 = vld [vmem:[%s666_s2 + $0x30] sm:$0xff]  ;;  %v303_v5 = vld [vmem:[%s666_s2 + $0x28] sm:$0xff]  ;;  %s499_s19 = sshll.u32 %s673_s25, 2  ;;  %s501_s12 = sshll.u32 %s673_s25, 3  ;;  %vm427_vm6 = vcmask 64512  }
   0xd   : > { %349 = vmatpush.msra.mxu1 %v305_v1  ;;  %v310_v6 = vld [vmem:[%s667_s3 + $0x20] sm:$0xff]  ;;  %v309_v8 = vld [vmem:[%s667_s3 + $0x18] sm:$0xff]  ;;  %s282_s26 = scalar_lea.vmem %s664_s0, %s499_s19  ;;  %s286_s29 = scalar_lea.vmem %s665_s1, %s499_s19  ;;  %v308_v14 = vld [vmem:[%s667_s3 + $0x10] sm:$0xff] }
   0xe   : > { %327 = vmatpush.msra.mxu0 %v312_v2  ;;  %v302_v7 = vld [vmem:[%s666_s2 + $0x20] sm:$0xff]  ;;  %v301_v9 = vld [vmem:[%s666_s2 + $0x18] sm:$0xff]  ;;  %v300_v15 = vld [vmem:[%s666_s2 + $0x10] sm:$0xff]  ;;  %s290_s15 = scalar_lea.vmem %s671_s7, %s501_s12 }
   0xf   : > { %350 = vmatpush.msra.mxu1 %v304_v3  ;;  %v291_v10 = vld [vmem:[%s282_s26] sm:$0xf]  ;;  %v307_v17 = vld [vmem:[%s667_s3 + $0x8] sm:$0xff]  ;;  %v388_v23 = vld [vmem:[%s669_s5 + $0x18] sm:$0xff] }
  0x10   : > { %328 = vmatpush.msra.mxu0 %v311_v4  ;;  %v293_v11 = vld [vmem:[%s286_s29] sm:$0xf]  ;;  %v292_v12 = vunpack.c.l.bf16 %v291_v10  ;;  %v299_v18 = vld [vmem:[%s666_s2 + $0x8] sm:$0xff]  ;;  %v387_v24 = vld [vmem:[%s669_s5 + $0x10] sm:$0xff]  ;;  %409 = vmatpush.msra.mxu2 %v388_v23 }
  0x11   : > { %351 = vmatpush.msra.mxu1 %v303_v5  ;;  %v294_v13 = vunpack.c.l.bf16 %v293_v11  ;;  %v306_v19 = vld [vmem:[%s667_s3] sm:$0xff]  ;;  %v386_v25 = vld [vmem:[%s669_s5 + $0x8] sm:$0xff] }
  0x12   : > { %329 = vmatpush.msra.mxu0 %v310_v6  ;;  %v298_v20 = vld [vmem:[%s666_s2] sm:$0xff]  ;;  %410 = vmatpush.msra.mxu2 %v387_v24 }
  0x13   : > { %352 = vmatpush.msra.mxu1 %v302_v7  ;;  %v296_v16 = vsub.f32 %v292_v12, %v294_v13  ;;  %v295_v22 = vmul.f32 %v294_v13, %v292_v12  ;;  %v385_v26 = vld [vmem:[%s669_s5] sm:$0xff] }
  0x14   : > { %330 = vmatpush.msra.mxu0 %v309_v8  ;;  %411 = vmatpush.msra.mxu2 %v386_v25  ;;  %v516_v27 = vld [vmem:[%s668_s4] ss:$0 sm:$0xff] }
  0x15   : > { %353 = vmatpush.msra.mxu1 %v301_v9  ;;  %v297_v21 = vand.u32 2147483647, %v296_v16  ;;  %v517_v45 = vld [vmem:[%s670_s6] ss:$0 sm:$0xff] }
  0x16   : > { %331 = vmatpush.msra.mxu0 %v308_v14  ;;  %412 = vmatpush.msra.mxu2 %v385_v26 }
  0x17   : > { %354 = vmatpush.msra.mxu1 %v300_v15 }
  0x18   : > { %332 = vmatpush.msra.mxu0 %v307_v17 }
  0x19   : > { %355 = vmatpush.msra.mxu1 %v299_v18 }
  0x1a   : > { %333 = vmatpush.msra.mxu0 %v306_v19 }
  0x1b   : > { %356 = vmatpush.msra.mxu1 %v298_v20  ;;  %502 = vmatmul.msk.f32.vlgmr.msra.gmra.mxu0 %vm314_vm0, %v297_v21 }
  0x1c   : > { %503 = vmatmul.msk.f32.vlgmr.msra.gmra.mxu1 %vm314_vm0, %v295_v22 }
  0x98   : > { %v335_v28 = vpop.f32.mrf.mxu0 }
  0x99   : > { %v358_v29 = vpop.f32.mrf.mxu1 }
  0x9a   : > { %v359_v30 = vadd.f32 %v358_v29, %v335_v28 }
  0x9c   : > { %v365_v31 = vadd.f32 %v516_v27, %v359_v30 }
  0x9e   : > { %v504_v32 = vmul.f32 -1.442695, %v365_v31 }
  0xa0   : > { %518 = vpow2.f32 %v504_v32 }
  0xa6   : > { %v519_v33 = vpop.eup %518 }
  0xa7   : > { %v369_v34 = vadd.f32 1.0, %v519_v33 }
  0xa9   : > { %520 = vrcp.f32 %v369_v34  ;;  %v381_v38 = vand.u32 2147483648, %v369_v34  ;;  %v379_v40 = vand.u32 2147483647, %v369_v34  ;;  %vm375_vm2 = vweird.f32 %v369_v34 }
  0xab   : > { %v382_v42 = vor.u32 1.1754944e-38, %v381_v38  ;;  %vm380_vm5 = vcmp.eq.f32.partialorder %v379_v40, 8.507059e+37 }
  0xaf   : > { %v521_v35 = vpop.eup %520 }
  0xb0   : > { %v371_v36 = vmul.f32 %v521_v35, %v369_v34  ;;  %vm376_vm1 = vweird.f32 %v521_v35 }
  0xb1   : > { %vm377_vm3 = vmor %vm375_vm2, %vm376_vm1 }
  0xb2   : > { %v372_v37 = vsub.f32 1.0, %v371_v36 }
  0xb4   : > { %v373_v39 = vmul.f32 %v521_v35, %v372_v37 }
  0xb6   : > { %v374_v41 = vadd.f32 %v521_v35, %v373_v39 }
  0xb8   : > { %v378_v43 = vsel %vm377_vm3, %v521_v35, %v374_v41 }
  0xb9   : > { %v383_v44 = vsel %vm380_vm5, %v382_v42, %v378_v43 }
  0xba   : > { %505 = vmatmul.msk.f32.vlgmr.msra.gmra.mxu2 %vm393_vm4, %v383_v44 }
 0x13d   : > { %v414_v46 = vpop.f32.mrf.mxu2 }
 0x13e   : > { %v415_v47 = vadd.f32 %v517_v45, %v414_v46 }
 0x140   : > { %417 = vmax.xlane.f32.xlu0 %v415_v47 }
 0x1b3   : > { %v418_v48 = vpop.xlane.xlu0 %417 }
 0x1b4   : > { %v419_v49 = vsub.f32 %v415_v47, %v418_v48 }
 0x1b6   : > { %v420_v50 = vmul.f32 1.442695, %v419_v49 }
 0x1b8   : > { %522 = vpow2.f32 %v420_v50 }
 0x1be   : > { %v523_v51 = vpop.eup %522 }
 0x1bf   : > { %422 = vadd.xlane.f32.xlu0 %v523_v51 }
 0x232   : > { %v423_v52 = vpop.xlane.xlu0 %422 }
 0x233   : > { %524 = vlog2.f32 %v423_v52 }
 0x239   : > { %v525_v53 = vpop.eup %524 }
 0x23a   : > { %v425_v54 = vmul.f32 0.6931472, %v525_v53 }
 0x23c   : > { %v426_v55 = vsub.f32 %v419_v49, %v425_v54 }
 0x23e   : > { %428 = vst.msk [vmem:[%s290_s15] sm:$0xff] %vm427_vm6, %v426_v55 }
 0x23f PF: > { %s17_s24 = sadd.s32 1, %s532_s24  }
 0x240   : > { %p14_p4 = scmp.ge.s32.totalorder %s17_s24, 4  }
 0x242   :  { %16 = sbr.rel (!%p14_p4) target bundleno = 1 (0x1), region = 81 }

</bundles_post_ra>
